<compile_context>
chip_gen: v7x
topology: tpu7x:2x2x1
jax: 0.10.0
libtpu: 0.0.40
codegen_flags: <defaults>
</compile_context>

<pallas_src>
import functools

import jax
import jax.numpy as jnp
from jax.experimental import pallas as pl
from jax.experimental.pallas import tpu as pltpu


# ------------------------------ Pallas kernel ------------------------------ #

def _gat_layer_kernel(x_ref, w_ref, a_ref, adj_ref, bias_ref, o_ref,
                      *, num_heads, head_dim, negative_slope, apply_elu):
    # 1) Linear projection on the MXU (bf16 inputs, f32 accumulation).
    feat = jnp.dot(x_ref[...].astype(jnp.bfloat16),
                   w_ref[...].astype(jnp.bfloat16),
                   preferred_element_type=jnp.float32)            # (N, H*D)

    # 2) Attention logits for all heads in one small MXU matmul.
    #    scores[:, h]   = el_h  (source term),  scores[:, H+h] = er_h (dest term)
    scores = jnp.dot(feat, a_ref[...],
                     preferred_element_type=jnp.float32)          # (N, 2H)
    er = scores[:, num_heads:]                                    # (N, H) dst on sublanes
    el_t = jnp.transpose(scores[:, :num_heads], (1, 0))           # (H, N) src on lanes

    adj = adj_ref[...]                                            # (N_dst, N_src)
    edge_mask = adj > 0.0
    has_edge = jnp.sum(adj, axis=-1, keepdims=True) > 0.0         # guard isolated dst rows

    outs = []
    for h in range(num_heads):                                    # H is tiny & static
        e = er[:, h:h + 1] + el_t[h:h + 1, :]                     # (N_dst, N_src)
        e = jnp.where(e >= 0.0, e, negative_slope * e)            # leaky_relu
        e = jnp.where(edge_mask, e, -1e30)                        # mask non-edges
        e = e - jnp.max(e, axis=-1, keepdims=True)
        p = jnp.exp(e)
        inv = pl.reciprocal(jnp.sum(p, axis=-1, keepdims=True), approx=True)
        alpha = jnp.where(has_edge, p * inv, 0.0)
        feat_h = feat[:, h * head_dim:(h + 1) * head_dim]         # (N, D)
        outs.append(jnp.dot(alpha.astype(jnp.bfloat16),
                            feat_h.astype(jnp.bfloat16),
                            preferred_element_type=jnp.float32))  # (N, D)

    out = outs[0] if num_heads == 1 else jnp.concatenate(outs, axis=-1)  # (N, H*D)
    out = out + bias_ref[...]
    if apply_elu:
        out = jnp.where(out > 0.0, out, jnp.exp(out) - 1.0)       # fused ELU
    o_ref[...] = out


def gat_layer(adj, x, w, a_cat, bias, *, num_heads, head_dim,
              negative_slope, apply_elu):
    """One fused GATConv layer: (N, Fin) -> (N, H*D) in flattened head layout."""
    n, fin = x.shape
    hd = num_heads * head_dim
    kernel = functools.partial(_gat_layer_kernel,
                               num_heads=num_heads, head_dim=head_dim,
                               negative_slope=negative_slope, apply_elu=apply_elu)
    return pl.pallas_call(
        kernel,
        grid=(1,),
        out_shape=jax.ShapeDtypeStruct((n, hd), jnp.float32),
        in_specs=[pl.BlockSpec((n, fin), lambda i: (0, 0)),
                  pl.BlockSpec((fin, hd), lambda i: (0, 0)),
                  pl.BlockSpec((hd, 2 * num_heads), lambda i: (0, 0)),
                  pl.BlockSpec((n, n), lambda i: (0, 0)),
                  pl.BlockSpec((1, hd), lambda i: (0, 0))],
        out_specs=pl.BlockSpec((n, hd), lambda i: (0, 0)),
        compiler_params=pltpu.CompilerParams(
            dimension_semantics=("arbitrary",)),
    )(x, w, a_cat, adj, bias)


# ------------------------------- GAT forward -------------------------------- #

def gat_forward(adj, x, layer_params, num_layers, negative_slope=0.2):
    h = x
    for l in range(num_layers):
        p = layer_params[l]
        # output is already in flattened (N, H*D) layout == .flatten(1)
        h = gat_layer(adj, h, p["fc"], p["a_cat"], p["bias"],
                      num_heads=p["num_heads"], head_dim=p["head_dim"],
                      negative_slope=negative_slope, apply_elu=True)
    p = layer_params[-1]
    logits = gat_layer(adj, h, p["fc"], p["a_cat"], p["bias"],
                       num_heads=p["num_heads"], head_dim=p["head_dim"],
                       negative_slope=negative_slope, apply_elu=False)
    n = logits.shape[0]
    return jnp.mean(logits.reshape(n, p["num_heads"], p["head_dim"]), axis=1)


# ----------------------------- parameter init ------------------------------ #

def _build_attn_matrix(attn_l, attn_r):
    """Pack per-head attention vectors into a (H*D, 2H) block matrix so that
    feat @ A gives [el | er] for all heads with one MXU matmul."""
    nh, d = attn_l.shape
    eye = jnp.eye(nh, dtype=attn_l.dtype)
    a_l = (attn_l[:, :, None] * eye[:, None, :]).reshape(nh * d, nh)
    a_r = (attn_r[:, :, None] * eye[:, None, :]).reshape(nh * d, nh)
    return jnp.concatenate([a_l, a_r], axis=1)


def init_gat_params(key, num_layers, in_dim, num_hidden, num_classes, heads):
    dims_in = [in_dim] + [num_hidden * heads[l - 1] for l in range(1, num_layers + 1)]
    dims_out = [num_hidden] * num_layers + [num_classes]
    params = []
    gain = jnp.sqrt(2.0)
    for l in range(num_layers + 1):
        nh, fin, d = heads[l], dims_in[l], dims_out[l]
        key, k1, k2, k3 = jax.random.split(key, 4)
        std_fc = gain * jnp.sqrt(2.0 / (fin + nh * d))
        std_a = gain * jnp.sqrt(2.0 / (1 + d))
        attn_l = std_a * jax.random.normal(k2, (nh, d), jnp.float32)
        attn_r = std_a * jax.random.normal(k3, (nh, d), jnp.float32)
        params.append(dict(
            fc=std_fc * jax.random.normal(k1, (fin, nh * d), jnp.float32),
            a_cat=_build_attn_matrix(attn_l, attn_r),
            bias=jnp.zeros((1, nh * d), jnp.float32),
            num_heads=nh,
            head_dim=d,
        ))
    return params


# ----------------------------------- main ----------------------------------- #

if __name__ == "__main__":
    key = jax.random.PRNGKey(0)
    N, in_dim, num_hidden, num_classes = 16, 8, 8, 4
    num_layers = 1            # -> 1 hidden GAT layer + 1 output GAT layer
    heads = [2, 1]
    negative_slope = 0.2

    k_adj, k_x, k_p = jax.random.split(key, 3)
    # random sparse directed graph; self-loops guarantee non-zero in-degree
    adj = (jax.random.uniform(k_adj, (N, N)) < 0.3).astype(jnp.float32)
    adj = adj.at[jnp.arange(N), jnp.arange(N)].set(1.0)

    x = jax.random.normal(k_x, (N, in_dim), jnp.float32)
    params = init_gat_params(k_p, num_layers, in_dim, num_hidden,
                             num_classes, heads)

    logits = gat_forward(adj, x, params, num_layers, negative_slope)
    jax.block_until_ready(logits)

    assert logits.shape == (N, num_classes), logits.shape
    assert bool(jnp.all(jnp.isfinite(logits)))
    print("KERNEL_OK")
</pallas_src>

<mosaic_0001>
module attributes {stable_mosaic.version = 11 : i64} {
  func.func @_gat_layer_kernel(%arg0: i32, %arg1: memref<16x8xf32, #tpu.memory_space<vmem>>, %arg2: memref<8x16xf32, #tpu.memory_space<vmem>>, %arg3: memref<16x4xf32, #tpu.memory_space<vmem>>, %arg4: memref<16x16xf32, #tpu.memory_space<vmem>>, %arg5: memref<1x16xf32, #tpu.memory_space<vmem>>, %arg6: memref<16x16xf32, #tpu.memory_space<vmem>>) attributes {dimension_semantics = [#tpu.dimension_semantics<arbitrary>], iteration_bounds = array<i64: 1>, scalar_prefetch = 0 : i64, scratch_operands = 0 : i64, tpu.core_type = #tpu.core_type<tc>, window_params = [{pipeline_mode = #tpu.pipeline_mode<synchronous>, transform_indices = @transform_0, window_bounds = array<i64: 16, 8>}, {pipeline_mode = #tpu.pipeline_mode<synchronous>, transform_indices = @transform_1, window_bounds = array<i64: 8, 16>}, {pipeline_mode = #tpu.pipeline_mode<synchronous>, transform_indices = @transform_2, window_bounds = array<i64: 16, 4>}, {pipeline_mode = #tpu.pipeline_mode<synchronous>, transform_indices = @transform_3, window_bounds = array<i64: 16, 16>}, {pipeline_mode = #tpu.pipeline_mode<synchronous>, transform_indices = @transform_4, window_bounds = array<i64: 1, 16>}, {pipeline_mode = #tpu.pipeline_mode<synchronous>, transform_indices = @transform_5, window_bounds = array<i64: 16, 16>}]} {
    %c0 = arith.constant 0 : index
    %c0_0 = arith.constant 0 : index
    %0 = vector.load %arg1[%c0, %c0_0] : memref<16x8xf32, #tpu.memory_space<vmem>>, vector<16x8xf32>
    %1 = arith.truncf %0 : vector<16x8xf32> to vector<16x8xbf16>
    %c0_1 = arith.constant 0 : index
    %c0_2 = arith.constant 0 : index
    %2 = vector.load %arg2[%c0_1, %c0_2] : memref<8x16xf32, #tpu.memory_space<vmem>>, vector<8x16xf32>
    %3 = arith.truncf %2 : vector<8x16xf32> to vector<8x16xbf16>
    %cst = arith.constant dense<0.000000e+00> : vector<16x16xf32>
    %4 = tpu.matmul %1, %3, %cst {dimension_numbers = #tpu.dot_dimension_numbers<[1], [0], [0], [1], [0, 0, 1, 1], [], []>} : vector<16x8xbf16>, vector<8x16xbf16>, vector<16x16xf32> -> vector<16x16xf32>
    %c0_3 = arith.constant 0 : index
    %c0_4 = arith.constant 0 : index
    %5 = vector.load %arg3[%c0_3, %c0_4] : memref<16x4xf32, #tpu.memory_space<vmem>>, vector<16x4xf32>
    %cst_5 = arith.constant dense<0.000000e+00> : vector<16x4xf32>
    %6 = tpu.matmul %4, %5, %cst_5 {dimension_numbers = #tpu.dot_dimension_numbers<[1], [0], [0], [1], [0, 0, 1, 1], [], []>} : vector<16x16xf32>, vector<16x4xf32>, vector<16x4xf32> -> vector<16x4xf32>
    %7 = vector.extract_strided_slice %6 {offsets = [0, 2], sizes = [16, 2], strides = [1, 1]} : vector<16x4xf32> to vector<16x2xf32>
    %8 = vector.extract_strided_slice %6 {offsets = [0, 0], sizes = [16, 2], strides = [1, 1]} : vector<16x4xf32> to vector<16x2xf32>
    %9 = tpu.transpose %8, [1, 0] : vector<16x2xf32> -> vector<2x16xf32>
    %c0_6 = arith.constant 0 : index
    %c0_7 = arith.constant 0 : index
    %10 = vector.load %arg4[%c0_6, %c0_7] : memref<16x16xf32, #tpu.memory_space<vmem>>, vector<16x16xf32>
    %cst_8 = arith.constant 0.000000e+00 : f32
    %11 = vector.broadcast %cst_8 : f32 to vector<16x16xf32>
    %12 = arith.cmpf ogt, %10, %11 : vector<16x16xf32>
    %cst_9 = arith.constant dense<0.000000e+00> : vector<16xf32>
    %13 = vector.multi_reduction <add>, %10, %cst_9 [1] : vector<16x16xf32> to vector<16xf32>
    %14 = vector.shape_cast %13 : vector<16xf32> to vector<16x1xf32>
    %cst_10 = arith.constant 0.000000e+00 : f32
    %15 = vector.broadcast %cst_10 : f32 to vector<16x1xf32>
    %16 = arith.cmpf ogt, %14, %15 : vector<16x1xf32>
    %17 = vector.extract_strided_slice %7 {offsets = [0, 0], sizes = [16, 1], strides = [1, 1]} : vector<16x2xf32> to vector<16x1xf32>
    %18 = vector.extract_strided_slice %9 {offsets = [0, 0], sizes = [1, 16], strides = [1, 1]} : vector<2x16xf32> to vector<1x16xf32>
    %19 = vector.broadcast %17 : vector<16x1xf32> to vector<16x16xf32>
    %20 = vector.broadcast %18 : vector<1x16xf32> to vector<16x16xf32>
    %21 = arith.addf %19, %20 : vector<16x16xf32>
    %cst_11 = arith.constant 0.000000e+00 : f32
    %22 = vector.broadcast %cst_11 : f32 to vector<16x16xf32>
    %23 = arith.cmpf oge, %21, %22 : vector<16x16xf32>
    %cst_12 = arith.constant 2.000000e-01 : f32
    %24 = vector.broadcast %cst_12 : f32 to vector<16x16xf32>
    %25 = arith.mulf %24, %21 : vector<16x16xf32>
    %26 = arith.select %23, %21, %25 : vector<16x16xi1>, vector<16x16xf32>
    %cst_13 = arith.constant -1.000000e+30 : f32
    %27 = vector.broadcast %cst_13 : f32 to vector<16x16xf32>
    %28 = arith.select %12, %26, %27 : vector<16x16xi1>, vector<16x16xf32>
    %cst_14 = arith.constant dense<0xFF800000> : vector<16xf32>
    %29 = vector.multi_reduction <maximumf>, %28, %cst_14 [1] : vector<16x16xf32> to vector<16xf32>
    %30 = vector.shape_cast %29 : vector<16xf32> to vector<16x1xf32>
    %31 = vector.broadcast %30 : vector<16x1xf32> to vector<16x16xf32>
    %32 = arith.subf %28, %31 : vector<16x16xf32>
    %33 = math.exp %32 : vector<16x16xf32>
    %cst_15 = arith.constant dense<0.000000e+00> : vector<16xf32>
    %34 = vector.multi_reduction <add>, %33, %cst_15 [1] : vector<16x16xf32> to vector<16xf32>
    %35 = vector.shape_cast %34 : vector<16xf32> to vector<16x1xf32>
    %36 = tpu.reciprocal %35 {approx = true} : vector<16x1xf32> -> vector<16x1xf32>
    %37 = vector.broadcast %36 : vector<16x1xf32> to vector<16x16xf32>
    %38 = arith.mulf %33, %37 : vector<16x16xf32>
    %cst_16 = arith.constant 0.000000e+00 : f32
    %39 = vector.shape_cast %16 : vector<16x1xi1> to vector<16x1xi1>
    %40 = vector.broadcast %39 : vector<16x1xi1> to vector<16x16xi1>
    %41 = vector.broadcast %cst_16 : f32 to vector<16x16xf32>
    %42 = arith.select %40, %38, %41 : vector<16x16xi1>, vector<16x16xf32>
    %43 = vector.extract_strided_slice %4 {offsets = [0, 0], sizes = [16, 8], strides = [1, 1]} : vector<16x16xf32> to vector<16x8xf32>
    %44 = arith.truncf %42 : vector<16x16xf32> to vector<16x16xbf16>
    %45 = arith.truncf %43 : vector<16x8xf32> to vector<16x8xbf16>
    %cst_17 = arith.constant dense<0.000000e+00> : vector<16x8xf32>
    %46 = tpu.matmul %44, %45, %cst_17 {dimension_numbers = #tpu.dot_dimension_numbers<[1], [0], [0], [1], [0, 0, 1, 1], [], []>} : vector<16x16xbf16>, vector<16x8xbf16>, vector<16x8xf32> -> vector<16x8xf32>
    %47 = vector.extract_strided_slice %7 {offsets = [0, 1], sizes = [16, 1], strides = [1, 1]} : vector<16x2xf32> to vector<16x1xf32>
    %48 = vector.extract_strided_slice %9 {offsets = [1, 0], sizes = [1, 16], strides = [1, 1]} : vector<2x16xf32> to vector<1x16xf32>
    %49 = vector.broadcast %47 : vector<16x1xf32> to vector<16x16xf32>
    %50 = vector.broadcast %48 : vector<1x16xf32> to vector<16x16xf32>
    %51 = arith.addf %49, %50 : vector<16x16xf32>
    %cst_18 = arith.constant 0.000000e+00 : f32
    %52 = vector.broadcast %cst_18 : f32 to vector<16x16xf32>
    %53 = arith.cmpf oge, %51, %52 : vector<16x16xf32>
    %cst_19 = arith.constant 2.000000e-01 : f32
    %54 = vector.broadcast %cst_19 : f32 to vector<16x16xf32>
    %55 = arith.mulf %54, %51 : vector<16x16xf32>
    %56 = arith.select %53, %51, %55 : vector<16x16xi1>, vector<16x16xf32>
    %cst_20 = arith.constant -1.000000e+30 : f32
    %57 = vector.broadcast %cst_20 : f32 to vector<16x16xf32>
    %58 = arith.select %12, %56, %57 : vector<16x16xi1>, vector<16x16xf32>
    %cst_21 = arith.constant dense<0xFF800000> : vector<16xf32>
    %59 = vector.multi_reduction <maximumf>, %58, %cst_21 [1] : vector<16x16xf32> to vector<16xf32>
    %60 = vector.shape_cast %59 : vector<16xf32> to vector<16x1xf32>
    %61 = vector.broadcast %60 : vector<16x1xf32> to vector<16x16xf32>
    %62 = arith.subf %58, %61 : vector<16x16xf32>
    %63 = math.exp %62 : vector<16x16xf32>
    %cst_22 = arith.constant dense<0.000000e+00> : vector<16xf32>
    %64 = vector.multi_reduction <add>, %63, %cst_22 [1] : vector<16x16xf32> to vector<16xf32>
    %65 = vector.shape_cast %64 : vector<16xf32> to vector<16x1xf32>
    %66 = tpu.reciprocal %65 {approx = true} : vector<16x1xf32> -> vector<16x1xf32>
    %67 = vector.broadcast %66 : vector<16x1xf32> to vector<16x16xf32>
    %68 = arith.mulf %63, %67 : vector<16x16xf32>
    %cst_23 = arith.constant 0.000000e+00 : f32
    %69 = vector.shape_cast %16 : vector<16x1xi1> to vector<16x1xi1>
    %70 = vector.broadcast %69 : vector<16x1xi1> to vector<16x16xi1>
    %71 = vector.broadcast %cst_23 : f32 to vector<16x16xf32>
    %72 = arith.select %70, %68, %71 : vector<16x16xi1>, vector<16x16xf32>
    %73 = vector.extract_strided_slice %4 {offsets = [0, 8], sizes = [16, 8], strides = [1, 1]} : vector<16x16xf32> to vector<16x8xf32>
    %74 = arith.truncf %72 : vector<16x16xf32> to vector<16x16xbf16>
    %75 = arith.truncf %73 : vector<16x8xf32> to vector<16x8xbf16>
    %cst_24 = arith.constant dense<0.000000e+00> : vector<16x8xf32>
    %76 = tpu.matmul %74, %75, %cst_24 {dimension_numbers = #tpu.dot_dimension_numbers<[1], [0], [0], [1], [0, 0, 1, 1], [], []>} : vector<16x16xbf16>, vector<16x8xbf16>, vector<16x8xf32> -> vector<16x8xf32>
    %77 = tpu.concatenate %46, %76 in 1 : vector<16x8xf32>, vector<16x8xf32> -> vector<16x16xf32>
    %c0_25 = arith.constant 0 : index
    %c0_26 = arith.constant 0 : index
    %78 = vector.load %arg5[%c0_25, %c0_26] : memref<1x16xf32, #tpu.memory_space<vmem>>, vector<1x16xf32>
    %79 = vector.broadcast %78 : vector<1x16xf32> to vector<16x16xf32>
    %80 = arith.addf %77, %79 : vector<16x16xf32>
    %cst_27 = arith.constant 0.000000e+00 : f32
    %81 = vector.broadcast %cst_27 : f32 to vector<16x16xf32>
    %82 = arith.cmpf ogt, %80, %81 : vector<16x16xf32>
    %83 = math.exp %80 : vector<16x16xf32>
    %cst_28 = arith.constant 1.000000e+00 : f32
    %84 = vector.broadcast %cst_28 : f32 to vector<16x16xf32>
    %85 = arith.subf %83, %84 : vector<16x16xf32>
    %86 = arith.select %82, %80, %85 : vector<16x16xi1>, vector<16x16xf32>
    %c0_29 = arith.constant 0 : index
    %c0_30 = arith.constant 0 : index
    %87 = vector.load %arg6[%c0_29, %c0_30] : memref<16x16xf32, #tpu.memory_space<vmem>>, vector<16x16xf32>
    tpu.vector_store %arg6[%c0_29, %c0_30], %86 {strides = array<i32>} : memref<16x16xf32, #tpu.memory_space<vmem>>, vector<16x16xf32>,
    return
  }
  func.func @transform_0(%arg0: i32) -> (i32, i32) {
    %c0_i32 = arith.constant 0 : i32
    %c0_i32_0 = arith.constant 0 : i32
    %c0_i32_1 = arith.constant 0 : i32
    return %c0_i32, %c0_i32_0 : i32, i32
  }
  func.func @transform_1(%arg0: i32) -> (i32, i32) {
    %c0_i32 = arith.constant 0 : i32
    %c0_i32_0 = arith.constant 0 : i32
    %c0_i32_1 = arith.constant 0 : i32
    return %c0_i32, %c0_i32_0 : i32, i32
  }
  func.func @transform_2(%arg0: i32) -> (i32, i32) {
    %c0_i32 = arith.constant 0 : i32
    %c0_i32_0 = arith.constant 0 : i32
    %c0_i32_1 = arith.constant 0 : i32
    return %c0_i32, %c0_i32_0 : i32, i32
  }
  func.func @transform_3(%arg0: i32) -> (i32, i32) {
    %c0_i32 = arith.constant 0 : i32
    %c0_i32_0 = arith.constant 0 : i32
    %c0_i32_1 = arith.constant 0 : i32
    return %c0_i32, %c0_i32_0 : i32, i32
  }
  func.func @transform_4(%arg0: i32) -> (i32, i32) {
    %c0_i32 = arith.constant 0 : i32
    %c0_i32_0 = arith.constant 0 : i32
    %c0_i32_1 = arith.constant 0 : i32
    return %c0_i32, %c0_i32_0 : i32, i32
  }
  func.func @transform_5(%arg0: i32) -> (i32, i32) {
    %c0_i32 = arith.constant 0 : i32
    %c0_i32_0 = arith.constant 0 : i32
    %c0_i32_1 = arith.constant 0 : i32
    return %c0_i32, %c0_i32_0 : i32, i32
  }
}

</mosaic_0001>

<bundles_post_ra>
// kernel: tpu_custom_call.1
= control target key start
LH: loop header
LB: loop body
LE: loop exit
PB: predicated region body
PF: predicated region fallthrough
CT: control target
= control target key end

     0   :  { %vm31_vm0 = vcmask 1043456   ;;  %v547_v3 = vmov 0.0   ;;  %vm548_vm1 = vmmov 0   ;;  %s654_s0 = inlined_call_operand.vmem [shape: f32[16,8], index: 0, kind: input, shape index: {}]   ;;  %s655_s1 = inlined_call_operand.vmem [shape: f32[8,16], index: 1, kind: input, shape index: {}]   ;;  %s656_s2 = inlined_call_operand.vmem [shape: f32[16,4], index: 2, kind: input, shape index: {}]   ;;  %s657_s3 = inlined_call_operand.vmem [shape: f32[16,16], index: 3, kind: input, shape index: {}]   ;;  %s658_s4 = inlined_call_operand.vmem [shape: f32[1,16], index: 4, kind: input, shape index: {}]   ;;  %s659_s5 = inlined_call_operand.hbm [shape: f32[16,16], index: 5, kind: output, shape index: {}]  }
   0x1   :  { %v25_v0 = vld [vmem:[%s655_s1] sm:$0xff]  ;;  %v23_v2 = vld [vmem:[%s654_s0 + $0x8] sm:$0xff]  ;;  %462 = vmatprep.subr.bf16.mxu0 %v547_v3  ;;  %464 = vmatprep.mubr.msk.bf16.mxu0 %vm548_vm1, %v547_v3 }
   0x2   :  { %v22_v1 = vld [vmem:[%s654_s0] sm:$0xff]  ;;  %v26_v4 = vpack.c.bf16 %v25_v0, %v25_v0  ;;  %v77_v6 = vld [vmem:[%s656_s2 + $0x8] sm:$0xff] }
   0x3   :  { %v76_v5 = vld [vmem:[%s656_s2] sm:$0xff] }
   0x4   :  { %10 = vsyncpa [#allocation3], 0  ;;  %v487_v7 = vpack.c.bf16 %v77_v6, %v76_v5  ;;  %v33_v8 = vsel %vm31_vm0, %v26_v4, 0  ;;  %v24_v9 = vpack.c.bf16 %v23_v2, %v22_v1  ;;  %vm27_vm2 = vcmask 64512   ;;  %v192_v25 = vld [vmem:[%s657_s3] sm:$0xff]  ;;  %v193_v29 = vld [vmem:[%s657_s3 + $0x8] sm:$0xff] }
   0x5   :  { %463 = vmatpush3.bf16.msra.mxu0 %v33_v8  ;;  %vm78_vm3 = vcmask 130048   ;;  %v549_v15 = vmov 3   ;;  %v550_v18 = vmov 2   ;;  %v214_v19 = vlaneseq  ;;  %s551_s3 = smov 120   ;;  %s552_s29 = smov 8  }
   0x6   :  { %488 = vmatprep.subr.bf16.mxu1 %v487_v7  ;;  %481 = vmatprep.subr.bf16.mxu0 %v547_v3  ;;  %vm194_vm4 = vcmp.gt.f32.partialorder %v192_v25, 0.0  ;;  %vm195_vm6 = vcmp.gt.f32.partialorder %v193_v29, 0.0  ;;  %v196_v52 = vsel %vm78_vm3, %v192_v25, 0.0  ;;  %v199_v53 = vsel %vm78_vm3, %v193_v29, 0.0  ;;  %s553_s7 = smov [#allocation2]  }
   0x7   :  { %490 = vmatpush3.bf16.msra.mxu1 %v487_v7  ;;  %499 = vset.pattern.permute.xlu0 %v549_v15  ;;  %v215_v20 = vshrl.u32 %v214_v19, 7  ;;  %s433_s8 = sshll.u32 %s553_s7, 4  ;;  %s434_s8 = int_to_ptr.vmem [resolvable:$true] %s433_s8 }
   0x8   :  { %475 = vmatprep.subr.bf16.mxu1 %v547_v3  ;;  %465 = vmatmul.mubr.msk.bf16.vlgmr.msra.gmra.mrb[0].mxu0 %vm27_vm2, %v24_v9  ;;  %p528_p1 = scmp.lt.s32.totalorder %s434_s8, %s434_s8 }
   0x9   :  { %483 = vmatprep.mubr.msk.bf16.mxu0 %vm548_vm1, %v547_v3  ;;  %v312_v21 = vsub.s32 1, %v215_v20  ;;  %v216_v26 = vsub.s32 0, %v215_v20 }
  0xdb   :  { %v69_v10 = vpop.f32.mrb[0].mxu0 }
  0xdc   :  { %v466_v11 = vpop.f32.mrb[1].mxu0  ;;  %472 = vmatprep.mubr.msk.f32.mxu1 %vm78_vm3, %v69_v10 }
  0xdd   :  { %v72_v12 = vpop.f32.mrb[2].mxu0 }
  0xde   :  { %v604_v13 = vpack.c.bf16 %v72_v12, %v69_v10  ;;  %v467_v14 = vpop.f32.mrb[3].mxu0  ;;  %473 = vmatmul.mubr.msk.f32.vlgmr.msra.gmra.mrb[0].mxu1 %vm78_vm3, %v72_v12 }
  0xdf   :  { %477 = vmatprep.mubr.msk.bf16.mxu1 %vm548_vm1, %v547_v3 }
  0xe0   :  { %476 = vmatpush3.bf16.msra.mxu1 %v604_v13 }
 0x1b1   :  { %v474_v16 = vpop.f32.mrb[0].mxu1 }
 0x1b2   :  { %v151_v17 = vpop.f32.mrb[1].mxu1 }
 0x1b3   :  { %160 = vxpose.xlu1.b32.start [1/2] (short) (narrow) %v151_v17, 8  ;;  %303 = vperm.xlu0 %499, %v151_v17  }
 0x1b7   :  { %161 = vxpose.xlu1.b32.end [2/2] (short) (narrow) %v474_v16, 8  ;;  %307 = vperm.xlu0 %499, %v474_v16  }
 0x1bb   :  { %500 = vset.pattern.permute.xlu0 %v550_v18 }
 0x1bc   :  { %206 = vperm.xlu0 %500, %v151_v17  }
 0x1c0   :  { %502 = vset.pattern.permute.xlu0 %v549_v15 }
 0x1d5   :  { %501 = vset.pattern.permute.xlu1 %v550_v18 }
 0x1d6   :  { %211 = vperm.xlu1 %501, %v474_v16  }
 0x232   :  { %v304_v22 = vpop.permute.xlu0 %303 }
 0x233   :  { %v176_v23 = vpop.trf.xlu1 }
 0x234   :  { %v313_v24 = vrot.slane %v176_v23, %v312_v21  ;;  %v217_v33 = vrot.slane %v176_v23, %v216_v26 }
 0x236   :  { %v314_v27 = vadd.f32 %v313_v24, %v304_v22  ;;  %v308_v28 = vpop.permute.xlu0 %307 }
 0x237   :  { %v315_v30 = vadd.f32 %v313_v24, %v308_v28 }
 0x238   :  { %vm316_vm5 = vcmp.ge.f32.partialorder %v314_v27, 0.0  ;;  %v318_v31 = vmul.f32 0.2, %v314_v27 }
 0x239   :  { %v319_v32 = vmul.f32 0.2, %v315_v30  ;;  %vm317_vm7 = vcmp.ge.f32.partialorder %v315_v30, 0.0 }
 0x23a   :  { %v320_v34 = vsel %vm316_vm5, %v314_v27, %v318_v31 }
 0x23b   :  { %v207_v35 = vpop.permute.xlu0 %206  ;;  %v322_v36 = vsel %vm194_vm4, %v320_v34, -1e+30  ;;  %v321_v37 = vsel %vm317_vm7, %v315_v30, %v319_v32 }
 0x23c   :  { %v218_v38 = vadd.f32 %v217_v33, %v207_v35  ;;  %v324_v39 = vsel %vm78_vm3, %v322_v36, -inf  ;;  %v323_v40 = vsel %vm195_vm6, %v321_v37, -1e+30 }
 0x23d   :  { %325 = vmax.xlane.f32.xlu0 %v324_v39  ;;  %v327_v41 = vsel %vm78_vm3, %v323_v40, -inf  ;;  %v449_v39 = vld [vmem:[%s658_s4] ss:$0 sm:$0xff]  ;;  %s523_s4 = scalar_lea.vmem %s434_s8, 256 }
 0x23e   :  { %v222_v42 = vmul.f32 0.2, %v218_v38  ;;  %328 = vmax.xlane.f32.xlu1 %v327_v41  ;;  %vm220_vm8 = vcmp.ge.f32.partialorder %v218_v38, 0.0  ;;  %p524_p0 = scmp.ne.s32.totalorder %s434_s8, %s523_s4  ;;  %p529_p2 = scmp.lt.s32.totalorder %s523_s4, %s523_s4 }
 0x240   :  { %v224_v43 = vsel %vm220_vm8, %v218_v38, %v222_v42  ;;  %p530_p3 = por %p529_p2, %p528_p1 }
 0x241   :  { %v226_v44 = vsel %vm194_vm4, %v224_v43, -1e+30 }
 0x242   :  { %v228_v45 = vsel %vm78_vm3, %v226_v44, -inf  ;;  %p531_p4 = pnand %p530_p3, %p524_p0 }
 0x243   :  { %229 = vmax.xlane.f32.xlu0 %v228_v45 }
 0x255   :  { %v212_v46 = vpop.permute.xlu1 %211 }
 0x256   :  { %v219_v47 = vadd.f32 %v217_v33, %v212_v46 }
 0x258   :  { %v223_v48 = vmul.f32 0.2, %v219_v47  ;;  %vm221_vm9 = vcmp.ge.f32.partialorder %v219_v47, 0.0 }
 0x25a   :  { %v225_v49 = vsel %vm221_vm9, %v219_v47, %v223_v48 }
 0x25b   :  { %v227_v50 = vsel %vm195_vm6, %v225_v49, -1e+30 }
 0x25c   :  { %v231_v51 = vsel %vm78_vm3, %v227_v50, -inf }
 0x25d   :  { %232 = vmax.xlane.f32.xlu0 %v231_v51 }
 0x261   :  { %197 = vadd.xlane.f32.xlu0 %v196_v52 }
 0x265   :  { %200 = vadd.xlane.f32.xlu0 %v199_v53 }
 0x2ca   :  { %v326_v54 = vpop.xlane.xlu0 %325 }
 0x2cb   :  { %v330_v55 = vsub.f32 %v322_v36, %v326_v54  ;;  %v329_v56 = vpop.xlane.xlu1 %328 }
 0x2cc   :  { %v331_v57 = vsub.f32 %v323_v40, %v329_v56 }
 0x2cd   :  { %v332_v58 = vmul.f32 1.442695, %v330_v55 }
 0x2ce   :  { %v334_v59 = vmul.f32 1.442695, %v331_v57 }
 0x2d0   :  { %503 = vpow2.f32 %v334_v59  ;;  %v230_v60 = vpop.xlane.xlu0 %229 }
 0x2d1   :  { %v234_v61 = vsub.f32 %v226_v44, %v230_v60  ;;  %505 = vpow2.f32 %v332_v58 }
 0x2d3   :  { %v236_v62 = vmul.f32 1.442695, %v234_v61 }
 0x2d5   :  { %507 = vpow2.f32 %v236_v62 }
 0x2da   :  { %v504_v63 = vpop.eup %503 }
 0x2db   :  { %v339_v0 = vsel %vm78_vm3, %v504_v63, 0.0  ;;  %v506_v1 = vpop.eup %505 }
 0x2dc   :  { %340 = vadd.xlane.f32.xlu0 %v339_v0  ;;  %v336_v3 = vsel %vm78_vm3, %v506_v1, 0.0 }
 0x2df   :  { %v508_v2 = vpop.eup %507 }
 0x2e0   :  { %337 = vadd.xlane.f32.xlu0 %v336_v3  ;;  %v240_v4 = vsel %vm78_vm3, %v508_v2, 0.0 }
 0x2e1   :  { %241 = vadd.xlane.f32.xlu1 %v240_v4 }
 0x2ea   :  { %v233_v5 = vpop.xlane.xlu0 %232 }
 0x2eb   :  { %v235_v6 = vsub.f32 %v227_v50, %v233_v5 }
 0x2ed   :  { %v238_v7 = vmul.f32 1.442695, %v235_v6 }
 0x2ee   :  { %v198_v10 = vpop.xlane.xlu0 %197 }
 0x2ef   :  { %509 = vpow2.f32 %v238_v7  ;;  %vm202_vm10 = vcmp.gt.f32.partialorder %v198_v10, 0.0 }
 0x2f2   :  { %v201_v11 = vpop.xlane.xlu0 %200 }
 0x2f3   :  { %vm203_vm11 = vcmp.gt.f32.partialorder %v201_v11, 0.0 }
 0x2f6   :  { %350 = vrot.lane.b32.xlu0 %v604_v13, %s551_s3 }
 0x2f9   :  { %v510_v8 = vpop.eup %509 }
 0x2fa   :  { %v243_v9 = vsel %vm78_vm3, %v510_v8, 0.0 }
 0x2fb   :  { %244 = vadd.xlane.f32.xlu1 %v243_v9 }
 0x369   :  { %v341_v12 = vpop.xlane.xlu0 %340 }
 0x36a   :  { %511 = vrcp.f32 %v341_v12 }
 0x36d   :  { %v338_v14 = vpop.xlane.xlu0 %337 }
 0x36e   :  { %513 = vrcp.f32 %v338_v14  ;;  %v242_v22 = vpop.xlane.xlu1 %241 }
 0x36f   :  { %515 = vrcp.f32 %v242_v22 }
 0x371   :  { %v351_v15 = vpop.permute.xlu0 %350 }
 0x372   :  { %482 = vmatpush3.bf16.msra.mxu0 %v351_v15 }
 0x374   :  { %v512_v16 = vpop.eup %511 }
 0x375   :  { %v345_v17 = vmul.f32 %v512_v16, %v504_v63 }
 0x377   :  { %v347_v13 = vsel %vm203_vm11, %v345_v17, 0.0 }
 0x378   :  { %v514_v18 = vpop.eup %513 }
 0x379   :  { %v344_v19 = vmul.f32 %v514_v18, %v506_v1  ;;  %v516_v24 = vpop.eup %515 }
 0x37a   :  { %v248_v25 = vmul.f32 %v516_v24, %v508_v2 }
 0x37b   :  { %v346_v20 = vsel %vm202_vm10, %v344_v19, 0.0 }
 0x37c   :  { %v348_v21 = vpack.c.bf16 %v347_v13, %v346_v20  ;;  %v254_v28 = vsel %vm202_vm10, %v248_v25, 0.0 }
 0x37e   :  { %484 = vmatmul.mubr.msk.bf16.vlgmr.msra.gmra.mrb[4].mxu0 %vm78_vm3, %v348_v21 }
 0x388   :  { %v245_v23 = vpop.xlane.xlu1 %244 }
 0x389   :  { %517 = vrcp.f32 %v245_v23 }
 0x393   :  { %v518_v26 = vpop.eup %517 }
 0x394   :  { %v249_v27 = vmul.f32 %v518_v26, %v510_v8 }
 0x396   :  { %v255_v29 = vsel %vm203_vm11, %v249_v27, 0.0 }
 0x397   :  { %v256_v30 = vpack.c.bf16 %v255_v29, %v254_v28 }
 0x399   :  { %478 = vmatmul.mubr.msk.bf16.vlgmr.msra.gmra.mrb[4].mxu1 %vm78_vm3, %v256_v30 }
 0x451   :  { %v390_v31 = vpop.f32.mrb[4].mxu0 }
 0x452   :  { %399 = vrot.lane.b32.xlu1 %v390_v31, %s552_s29  ;;  %v485_v32 = vpop.f32.mrb[5].mxu0 }
 0x453   :  { %v393_v33 = vpop.f32.mrb[6].mxu0 }
 0x454   :  { %401 = vrot.lane.b32.xlu0 %v393_v33, %s552_s29  ;;  %v486_v34 = vpop.f32.mrb[7].mxu0 }
 0x46c   :  { %v295_v35 = vpop.f32.mrb[4].mxu1 }
 0x46d   :  { %v479_v36 = vpop.f32.mrb[5].mxu1 }
 0x46e   :  { %v298_v37 = vpop.f32.mrb[6].mxu1 }
 0x46f   :  { %v480_v38 = vpop.f32.mrb[7].mxu1 }
 0x4c4   :  { %v400_v40 = vpop.permute.xlu1 %399 }
 0x4c5   :  { %v405_v41 = vsel %vm27_vm2, %v295_v35, %v400_v40 }
 0x4c6   :  { %v414_v42 = vadd.f32 %v449_v39, %v405_v41  ;;  %v402_v43 = vpop.permute.xlu0 %401 }
 0x4c7   :  { %v406_v44 = vsel %vm27_vm2, %v298_v37, %v402_v43 }
 0x4c8   :  { %v418_v45 = vmul.f32 1.442695, %v414_v42  ;;  %v415_v46 = vadd.f32 %v449_v39, %v406_v44  ;;  %vm416_vm12 = vcmp.gt.f32.partialorder %v414_v42, 0.0 }
 0x4ca   :  { %519 = vpow2.f32 %v418_v45  ;;  %v420_v47 = vmul.f32 1.442695, %v415_v46  ;;  %vm417_vm13 = vcmp.gt.f32.partialorder %v415_v46, 0.0 }
 0x4cc   :  { %521 = vpow2.f32 %v420_v47 }
 0x4d4   :  { %v520_v48 = vpop.eup %519 }
 0x4d5   :  { %v450_v49 = vadd.f32 -1.0, %v520_v48 }
 0x4d6   :  { %v522_v50 = vpop.eup %521 }
 0x4d7   :  { %v424_v51 = vsel %vm416_vm12, %v414_v42, %v450_v49  ;;  %v451_v52 = vadd.f32 -1.0, %v522_v50 }
 0x4d8   :  { %426 = vst.msk [vmem:[#allocation2] sm:$0xff] %vm78_vm3, %v424_v51 }
 0x4d9   :  { %v425_v53 = vsel %vm417_vm13, %v415_v46, %v451_v52 }
 0x4da   :  { %427 = vst.msk [vmem:[#allocation2 + $0x8] sm:$0xff] %vm78_vm3, %v425_v53 }
 0x4db   :  { %534 = shalt.err (!%p531_p4)
}
 0x4dc   :  { %s535_s11 = scalar_lea.hbm %s659_s5, 256 }
 0x4dd   :  { %p536_p5 = scmp.ne.s32.totalorder %s659_s5, %s535_s11  ;;  %p539_p6 = scmp.lt.u32.totalorder %s535_s11, %s659_s5 }
 0x4df   :  { %p541_p7 = pnand %p539_p6, %p536_p5 }
 0x4e1   :  { %544 = shalt.err (!%p541_p7)
}
 0x4e2   :  { %s554_s16 = smov 128  }
 0x4e3   :  { %439 = dma.vmem_to_hbm [thread:$0]  %s434_s8, 256, %s659_s5, [#allocation3], %s554_s16, %s554_s16, %s552_s29  }
 0x4e4   :  { %545 = dma.done.wait [#allocation3], 256  }
 0x4e5   :  { %546 = vsyncadd [#allocation3], 4294967040 }
 0x4e6   :  { %443 = vsyncpa [#allocation3], 1 }

</bundles_post_ra>
